<compile_context>
chip_gen: v6e
topology: v6e:2x2x1
jax: 0.10.0
libtpu: 0.0.40
codegen_flags: <defaults>
</compile_context>

<pallas_src>
import functools

import jax
import jax.numpy as jnp
from jax.experimental import pallas as pl
from jax.experimental.pallas import tpu as pltpu

_EPS = 1e-8


def _cosine_dist_partial_kernel(e_ref, ec_ref, out_ref, *, tm, d, total_rows,
                                use_mxu):
    """One grid step: partial sum of (1 - cos) over a tile of `tm` rows."""
    i = pl.program_id(0)

    x = e_ref[...].astype(jnp.float32)
    y = ec_ref[...].astype(jnp.float32)

    ragged = (total_rows % tm) != 0
    if ragged:
        # Only the last tile can be partial; mask rows past the end so
        # uninitialized pad data never reaches the reductions.
        row = i * tm + jax.lax.broadcasted_iota(jnp.int32, (tm, 1), 0)
        valid = row < total_rows
        x = jnp.where(valid, x, jnp.float32(0.0))
        y = jnp.where(valid, y, jnp.float32(0.0))

    if use_mxu:
        # Offload the three row reductions to the (otherwise idle) MXU:
        # (tm, d) @ (d, 128) of ones -> every lane holds the row sum; take
        # lane 0.  Keeps the XLU free so the kernel stays HBM-bound.
        ones = jnp.ones((d, 128), dtype=jnp.float32)
        w12 = jnp.dot(x * y, ones, preferred_element_type=jnp.float32)[:, :1]
        w1 = jnp.dot(x * x, ones, preferred_element_type=jnp.float32)[:, :1]
        w2 = jnp.dot(y * y, ones, preferred_element_type=jnp.float32)[:, :1]
    else:
        # Large D: jnp.sum amortizes to VPU adds + one cross-lane reduce per
        # 8 rows, so keep the XLU path.
        w12 = jnp.sum(x * y, axis=-1, keepdims=True)   # (tm, 1)
        w1 = jnp.sum(x * x, axis=-1, keepdims=True)    # (tm, 1)
        w2 = jnp.sum(y * y, axis=-1, keepdims=True)    # (tm, 1)

    inv = jax.lax.rsqrt(jnp.maximum(w1 * w2, jnp.float32(_EPS * _EPS)))
    dist = jnp.float32(1.0) - w12 * inv                # (tm, 1)

    if ragged:
        # Masked rows have w12 == 0 -> dist == 1; zero their contribution.
        dist = jnp.where(valid, dist, jnp.float32(0.0))

    tile_sum = jnp.sum(dist)
    # Lane-dense partial-sum slab; wrapper reads lane 0 of each tile.
    out_ref[...] = jnp.full((1, 1, 128), tile_sum, dtype=jnp.float32)


def _default_vmem_limit():
    """Generation-gated scoped-VMEM limit."""
    try:
        cap = pltpu.get_tpu_info().vmem_capacity_bytes
    except Exception:
        cap = 64 << 20                       # conservative (v7x-sized)
    if cap >= (96 << 20):                    # 128 MiB-class parts (v5e / v6e)
        return 96 << 20
    return 48 << 20                          # v7x: 64 MiB per TensorCore


def _pick_tm(n, d, itemsize, vmem_limit_bytes):
    """Largest multiple-of-8 row tile that fits the VMEM budget.

    Accounts for 2 inputs x double-buffered pipeline in the *input* dtype
    plus ~4 tile-sized f32 intermediates (upcasts / elementwise products)
    that Mosaic materializes in VMEM for large tiles.
    """
    per_row = 2 * 2 * d * itemsize + 4 * d * 4
    margin = 2 << 20
    tm = max(8, (vmem_limit_bytes - margin) // per_row)
    tm = min(tm, 16384)                      # per-step overhead negligible past this
    n_pad = ((n + 7) // 8) * 8
    tm = min(tm, n_pad)
    # Keep several grid steps when the batch is large enough so the
    # "parallel" axis can split across v7x's two TensorCores and the DMA
    # pipeline has work to overlap; never shrink tiles below 1024 rows.
    if n_pad >= 2048:
        split_tm = ((-(-n_pad // 8) + 7) // 8) * 8
        tm = min(tm, max(1024, split_tm))
    tm = max(8, (tm // 8) * 8)               # (8, 128) sublane alignment
    return int(tm)


def cosine_dist_loss(e, e_c, *, tm=None, vmem_limit_bytes=None):
    """Pallas implementation of CosineDistLoss.forward(e, e_c)."""
    assert e.shape == e_c.shape and e.ndim == 2
    n, d = e.shape
    itemsize = jnp.dtype(e.dtype).itemsize
    if vmem_limit_bytes is None:
        vmem_limit_bytes = _default_vmem_limit()
    if tm is None:
        tm = _pick_tm(n, d, itemsize, vmem_limit_bytes)
    num_tiles = -(-n // tm)

    # MXU row-reduction offload pays off at small D; it also needs D to be a
    # lane multiple so the ones contraction needs no extra padding handling.
    use_mxu = (d % 128 == 0) and (d <= 512)

    kernel = functools.partial(_cosine_dist_partial_kernel, tm=tm, d=d,
                               total_rows=n, use_mxu=use_mxu)

    cost = pl.CostEstimate(
        flops=6 * n * d + 8 * n,
        transcendentals=n,
        bytes_accessed=2 * n * d * itemsize + num_tiles * 512,
    )

    partials = pl.pallas_call(
        kernel,
        out_shape=jax.ShapeDtypeStruct((num_tiles, 1, 128), jnp.float32),
        grid_spec=pltpu.PrefetchScalarGridSpec(
            num_scalar_prefetch=0,
            grid=(num_tiles,),
            in_specs=[
                pl.BlockSpec((tm, d), lambda i: (i, 0)),
                pl.BlockSpec((tm, d), lambda i: (i, 0)),
            ],
            out_specs=pl.BlockSpec((1, 1, 128), lambda i: (i, 0, 0)),
        ),
        compiler_params=pltpu.CompilerParams(
            dimension_semantics=("parallel",),       # independent per-tile partials
            vmem_limit_bytes=int(vmem_limit_bytes),  # allow large double-buffered tiles
        ),
        cost_estimate=cost,
    )(e, e_c)

    # Final reduction + mean in the wrapper (tiny: num_tiles scalars).
    return jnp.sum(partials[:, 0, 0]) / jnp.float32(n)


def _reference(e, e_c):
    x = e.astype(jnp.float32)
    y = e_c.astype(jnp.float32)
    w12 = jnp.sum(x * y, axis=1)
    w1 = jnp.sum(x * x, axis=1)
    w2 = jnp.sum(y * y, axis=1)
    cos = w12 / jnp.sqrt(jnp.maximum(w1 * w2, _EPS * _EPS))
    return jnp.mean(1.0 - cos)


if __name__ == "__main__":
    key = jax.random.PRNGKey(0)
    k1, k2 = jax.random.split(key)

    # Small shapes consistent with (batch, embedding_dim); D=128 exercises
    # the MXU row-reduction path.
    N, D = 16, 128
    e = jax.random.normal(k1, (N, D), dtype=jnp.float32)
    e_c = jax.random.normal(k2, (N, D), dtype=jnp.float32)

    loss = jax.block_until_ready(cosine_dist_loss(e, e_c))
    ref = jax.block_until_ready(_reference(e, e_c))
    assert jnp.allclose(loss, ref, atol=1e-4, rtol=1e-4), (loss, ref)

    # Ragged batch (partial last tile: in-kernel input + distance masking).
    N2 = 37
    e2 = jax.random.normal(k1, (N2, D), dtype=jnp.float32)
    e2_c = jax.random.normal(k2, (N2, D), dtype=jnp.float32)
    loss2 = jax.block_until_ready(cosine_dist_loss(e2, e2_c))
    ref2 = jax.block_until_ready(_reference(e2, e2_c))
    assert jnp.allclose(loss2, ref2, atol=1e-4, rtol=1e-4), (loss2, ref2)

    # bf16 inputs (half the HBM bytes; kernel upcasts to f32 internally).
    loss_bf16 = jax.block_until_ready(
        cosine_dist_loss(e.astype(jnp.bfloat16), e_c.astype(jnp.bfloat16)))
    ref_bf16 = jax.block_until_ready(
        _reference(e.astype(jnp.bfloat16), e_c.astype(jnp.bfloat16)))
    assert jnp.allclose(loss_bf16, ref_bf16, atol=5e-3, rtol=5e-3), (loss_bf16, ref_bf16)

    # Non-128-multiple D and large D exercise the jnp.sum (XLU) path.
    for D_alt in (96, 1024):
        ea = jax.random.normal(k1, (N, D_alt), dtype=jnp.float32)
        eb = jax.random.normal(k2, (N, D_alt), dtype=jnp.float32)
        la = jax.block_until_ready(cosine_dist_loss(ea, eb))
        ra = jax.block_until_ready(_reference(ea, eb))
        assert jnp.allclose(la, ra, atol=1e-4, rtol=1e-4), (D_alt, la, ra)

    print("KERNEL_OK")
</pallas_src>

<mosaic_0001>
module attributes {stable_mosaic.version = 11 : i64} {
  func.func @_cosine_dist_partial_kernel(%arg0: i32, %arg1: memref<16x128xf32, #tpu.memory_space<vmem>>, %arg2: memref<16x128xf32, #tpu.memory_space<vmem>>, %arg3: memref<1x1x128xf32, #tpu.memory_space<vmem>>) attributes {dimension_semantics = [#tpu.dimension_semantics<parallel>], iteration_bounds = array<i64: 1>, scalar_prefetch = 0 : i64, scratch_operands = 0 : i64, tpu.core_type = #tpu.core_type<tc>, window_params = [{transform_indices = @transform_0, window_bounds = array<i64: 16, 128>}, {transform_indices = @transform_1, window_bounds = array<i64: 16, 128>}, {transform_indices = @transform_2, window_bounds = array<i64: 1, 1, 128>}]} {
    %c0 = arith.constant 0 : index
    %c0_0 = arith.constant 0 : index
    %0 = vector.load %arg1[%c0, %c0_0] : memref<16x128xf32, #tpu.memory_space<vmem>>, vector<16x128xf32>
    %c0_1 = arith.constant 0 : index
    %c0_2 = arith.constant 0 : index
    %1 = vector.load %arg2[%c0_1, %c0_2] : memref<16x128xf32, #tpu.memory_space<vmem>>, vector<16x128xf32>
    %cst = arith.constant 1.000000e+00 : f32
    %2 = vector.broadcast %cst : f32 to vector<128x128xf32>
    %3 = arith.mulf %0, %1 : vector<16x128xf32>
    %cst_3 = arith.constant dense<0.000000e+00> : vector<16x128xf32>
    %4 = tpu.matmul %3, %2, %cst_3 {dimension_numbers = #tpu.dot_dimension_numbers<[1], [0], [0], [1], [0, 0, 1, 1], [], []>} : vector<16x128xf32>, vector<128x128xf32>, vector<16x128xf32> -> vector<16x128xf32>
    %5 = vector.extract_strided_slice %4 {offsets = [0, 0], sizes = [16, 1], strides = [1, 1]} : vector<16x128xf32> to vector<16x1xf32>
    %6 = arith.mulf %0, %0 : vector<16x128xf32>
    %cst_4 = arith.constant dense<0.000000e+00> : vector<16x128xf32>
    %7 = tpu.matmul %6, %2, %cst_4 {dimension_numbers = #tpu.dot_dimension_numbers<[1], [0], [0], [1], [0, 0, 1, 1], [], []>} : vector<16x128xf32>, vector<128x128xf32>, vector<16x128xf32> -> vector<16x128xf32>
    %8 = vector.extract_strided_slice %7 {offsets = [0, 0], sizes = [16, 1], strides = [1, 1]} : vector<16x128xf32> to vector<16x1xf32>
    %9 = arith.mulf %1, %1 : vector<16x128xf32>
    %cst_5 = arith.constant dense<0.000000e+00> : vector<16x128xf32>
    %10 = tpu.matmul %9, %2, %cst_5 {dimension_numbers = #tpu.dot_dimension_numbers<[1], [0], [0], [1], [0, 0, 1, 1], [], []>} : vector<16x128xf32>, vector<128x128xf32>, vector<16x128xf32> -> vector<16x128xf32>
    %11 = vector.extract_strided_slice %10 {offsets = [0, 0], sizes = [16, 1], strides = [1, 1]} : vector<16x128xf32> to vector<16x1xf32>
    %12 = arith.mulf %8, %11 : vector<16x1xf32>
    %cst_6 = arith.constant 1.000000e-16 : f32
    %13 = vector.broadcast %cst_6 : f32 to vector<16x1xf32>
    %14 = arith.maximumf %12, %13 : vector<16x1xf32>
    %15 = math.rsqrt %14 : vector<16x1xf32>
    %16 = arith.mulf %5, %15 : vector<16x1xf32>
    %cst_7 = arith.constant 1.000000e+00 : f32
    %17 = vector.broadcast %cst_7 : f32 to vector<16x1xf32>
    %18 = arith.subf %17, %16 : vector<16x1xf32>
    %19 = vector.shape_cast %18 : vector<16x1xf32> to vector<1x16x1xf32>
    %cst_8 = arith.constant dense<0.000000e+00> : vector<1xf32>
    %20 = vector.multi_reduction <add>, %19, %cst_8 [1, 2] : vector<1x16x1xf32> to vector<1xf32>
    %21 = vector.shape_cast %20 : vector<1xf32> to vector<1x1x1xf32>
    %22 = vector.extract %21[0, 0, 0] : f32 from vector<1x1x1xf32>
    %23 = vector.broadcast %22 : f32 to vector<1x1x128xf32>
    %c0_9 = arith.constant 0 : index
    %c0_10 = arith.constant 0 : index
    %c0_11 = arith.constant 0 : index
    %24 = vector.load %arg3[%c0_9, %c0_10, %c0_11] : memref<1x1x128xf32, #tpu.memory_space<vmem>>, vector<1x1x128xf32>
    tpu.vector_store %arg3[%c0_9, %c0_10, %c0_11], %23 {strides = array<i32>} : memref<1x1x128xf32, #tpu.memory_space<vmem>>, vector<1x1x128xf32>,
    return
  }
  func.func @transform_0(%arg0: i32) -> (i32, i32) {
    %c0_i32 = arith.constant 0 : i32
    %c0_i32_0 = arith.constant 0 : i32
    return %arg0, %c0_i32 : i32, i32
  }
  func.func @transform_1(%arg0: i32) -> (i32, i32) {
    %c0_i32 = arith.constant 0 : i32
    %c0_i32_0 = arith.constant 0 : i32
    return %arg0, %c0_i32 : i32, i32
  }
  func.func @transform_2(%arg0: i32) -> (i32, i32, i32) {
    %c0_i32 = arith.constant 0 : i32
    %c0_i32_0 = arith.constant 0 : i32
    %c0_i32_1 = arith.constant 0 : i32
    return %arg0, %c0_i32, %c0_i32_0 : i32, i32, i32
  }
}

</mosaic_0001>

<bundles_post_ra>
// kernel: tpu_custom_call.1
= control target key start
LH: loop header
LB: loop body
LE: loop exit
PB: predicated region body
PF: predicated region fallthrough
CT: control target
= control target key end

     0   :  { %7 = vsyncpa [#allocation3], 0  ;;  %s679_s0 = inlined_call_operand.hbm [shape: f32[16,128], index: 0, kind: input, shape index: {}]   ;;  %s680_s1 = inlined_call_operand.hbm [shape: f32[16,128], index: 1, kind: input, shape index: {}]   ;;  %s681_s2 = inlined_call_operand.hbm [shape: f32[1,1,128], index: 2, kind: output, shape index: {}]  }
   0x1   :  { %8 = vsyncpa [#allocation6], 0 }
   0x2   :  { %9 = vsyncpa [#allocation4], 0  ;;  %s553_s9 = smov [#allocation2]  }
   0x3   :  { %s15_s10 = sshll.u32 %s553_s9, 4  ;;  %s16_s10 = int_to_ptr.vmem [resolvable:$true] %s15_s10 }
   0x4   :  { %s495_s11 = scalar_lea.vmem %s16_s10, 256  ;;  %p500_p1 = scmp.lt.s32.totalorder %s16_s10, %s16_s10 }
   0x5   :  { %p496_p0 = scmp.ne.s32.totalorder %s16_s10, %s495_s11  ;;  %p501_p2 = scmp.lt.s32.totalorder %s495_s11, %s495_s11 }
   0x7   :  { %p502_p3 = por %p501_p2, %p500_p1 }
   0x9   :  { %p503_p4 = pnand %p502_p3, %p496_p0 }
   0xb   :  { %506 = shalt.err (!%p503_p4)
}
   0xc   :  { %s554_s12 = smov 128   ;;  %s555_s13 = smov 8  }
   0xd   :  { %21 = dma.hbm_to_vmem [thread:$0]  %s679_s0, 256, %s16_s10, [#allocation3], %s554_s12, %s554_s12, %s555_s13  }
   0xe   :  { %s556_s16 = smov [#allocation5]  }
   0xf   :  { %s27_s17 = sshll.u32 %s556_s16, 4  ;;  %s28_s17 = int_to_ptr.vmem [resolvable:$true] %s27_s17 }
  0x10   :  { %s515_s18 = scalar_lea.vmem %s28_s17, 256  ;;  %p520_p6 = scmp.lt.s32.totalorder %s28_s17, %s28_s17 }
  0x11   :  { %p516_p5 = scmp.ne.s32.totalorder %s28_s17, %s515_s18  ;;  %p521_p7 = scmp.lt.s32.totalorder %s515_s18, %s515_s18 }
  0x13   :  { %p522_p8 = por %p521_p7, %p520_p6 }
  0x15   :  { %p523_p9 = pnand %p522_p8, %p516_p5 }
  0x17   :  { %526 = shalt.err (!%p523_p9)
}
  0x18   :  { %33 = dma.hbm_to_vmem [thread:$0]  %s680_s1, 256, %s28_s17, [#allocation6], %s554_s12, %s554_s12, %s555_s13  }
  0x19   :  { %547 = dma.done.wait [#allocation3], 256  }
  0x1a   :  { %548 = vsyncadd [#allocation3], 4294967040 }
  0x1b   :  { %549 = dma.done.wait [#allocation6], 256  }
  0x1c   :  { %550 = vsyncadd [#allocation6], 4294967040  ;;  %v557_v0 = vmov 1.0   ;;  %v40_v1 = vld [vmem:[#allocation2] sm:$0xff]  ;;  %v42_v2 = vld [vmem:[#allocation5] sm:$0xff]  ;;  %vm285_vm0 = vcmask 7168  }
  0x1d   :  { %370 = vmatprep.subr.mxu0 %v557_v0  ;;  %405 = vmatprep.subr.mxu1 %v557_v0  ;;  %v44_v3 = vmul.f32 %v42_v2, %v40_v1  ;;  %v41_v4 = vld [vmem:[#allocation2 + $0x8] sm:$0xff]  ;;  %v43_v5 = vld [vmem:[#allocation5 + $0x8] sm:$0xff]  ;;  %v121_v7 = vmul.f32 %v40_v1, %v40_v1  ;;  %v198_v9 = vmul.f32 %v42_v2, %v42_v2  ;;  %s558_s0 = smov [#allocation7]  }
  0x1e   :  { %371 = vmatpush3.msra.mxu0 %v557_v0  ;;  %406 = vmatpush3.msra.mxu1 %v557_v0  ;;  %v45_v6 = vmul.f32 %v43_v5, %v41_v4  ;;  %v122_v8 = vmul.f32 %v41_v4, %v41_v4  ;;  %v199_v10 = vmul.f32 %v43_v5, %v43_v5  ;;  %s306_s1 = sshll.u32 %s558_s0, 4  ;;  %s307_s1 = int_to_ptr.vmem [resolvable:$true] %s306_s1 }
  0x1f   :  { %372 = vmatprep.subr.mxu0 %v557_v0  ;;  %407 = vmatprep.subr.mxu1 %v557_v0  ;;  %s527_s22 = scalar_lea.vmem %s307_s1, 16  ;;  %s531_s23 = scalar_lea.vmem %s307_s1, 32 }
  0x20   :  { %373 = vmatpush3.msra.mxu0 %v557_v0  ;;  %408 = vmatpush3.msra.mxu1 %v557_v0  ;;  %p528_p10 = scmp.ne.s32.totalorder %s307_s1, %s527_s22  ;;  %p532_p11 = scmp.lt.s32.totalorder %s307_s1, %s307_s1 }
  0x21   :  { %374 = vmatprep.subr.mxu0 %v557_v0  ;;  %409 = vmatprep.subr.mxu1 %v557_v0  ;;  %p533_p12 = scmp.lt.s32.totalorder %s531_s23, %s527_s22 }
  0x22   :  { %375 = vmatpush3.msra.mxu0 %v557_v0  ;;  %410 = vmatpush3.msra.mxu1 %v557_v0 }
  0x23   :  { %376 = vmatprep.subr.mxu0 %v557_v0  ;;  %411 = vmatprep.subr.mxu1 %v557_v0  ;;  %p534_p13 = por %p533_p12, %p532_p11 }
  0x24   :  { %377 = vmatpush3.msra.mxu0 %v557_v0  ;;  %412 = vmatpush3.msra.mxu1 %v557_v0 }
  0x25   :  { %378 = vmatprep.subr.mxu0 %v557_v0  ;;  %413 = vmatprep.subr.mxu1 %v557_v0  ;;  %p535_p0 = pnand %p534_p13, %p528_p10 }
  0x26   :  { %379 = vmatpush3.msra.mxu0 %v557_v0  ;;  %402 = vmatprep.mubr.f32.mxu0 %v44_v3 }
  0x27   :  { %380 = vmatprep.subr.mxu0 %v557_v0  ;;  %414 = vmatpush3.msra.mxu1 %v557_v0 }
  0x28   :  { %381 = vmatpush3.msra.mxu0 %v557_v0  ;;  %415 = vmatprep.subr.mxu1 %v557_v0 }
  0x29   :  { %382 = vmatprep.subr.mxu0 %v557_v0  ;;  %416 = vmatpush3.msra.mxu1 %v557_v0 }
  0x2a   :  { %383 = vmatpush3.msra.mxu0 %v557_v0  ;;  %417 = vmatprep.subr.mxu1 %v557_v0 }
  0x2b   :  { %384 = vmatprep.subr.mxu0 %v557_v0  ;;  %418 = vmatpush3.msra.mxu1 %v557_v0 }
  0x2c   :  { %385 = vmatpush3.msra.mxu0 %v557_v0  ;;  %419 = vmatprep.subr.mxu1 %v557_v0 }
  0x2d   :  { %386 = vmatprep.subr.mxu0 %v557_v0  ;;  %420 = vmatpush3.msra.mxu1 %v557_v0 }
  0x2e   :  { %387 = vmatpush3.msra.mxu0 %v557_v0  ;;  %421 = vmatprep.subr.mxu1 %v557_v0 }
  0x2f   :  { %388 = vmatprep.subr.mxu0 %v557_v0  ;;  %422 = vmatpush3.msra.mxu1 %v557_v0 }
  0x30   :  { %389 = vmatpush3.msra.mxu0 %v557_v0  ;;  %423 = vmatprep.subr.mxu1 %v557_v0 }
  0x31   :  { %390 = vmatprep.subr.mxu0 %v557_v0  ;;  %424 = vmatpush3.msra.mxu1 %v557_v0 }
  0x32   :  { %391 = vmatpush3.msra.mxu0 %v557_v0  ;;  %425 = vmatprep.subr.mxu1 %v557_v0 }
  0x33   :  { %392 = vmatprep.subr.mxu0 %v557_v0  ;;  %426 = vmatpush3.msra.mxu1 %v557_v0 }
  0x34   :  { %393 = vmatpush3.msra.mxu0 %v557_v0  ;;  %427 = vmatprep.subr.mxu1 %v557_v0 }
  0x35   :  { %394 = vmatprep.subr.mxu0 %v557_v0  ;;  %428 = vmatpush3.msra.mxu1 %v557_v0 }
  0x36   :  { %395 = vmatpush3.msra.mxu0 %v557_v0  ;;  %429 = vmatprep.subr.mxu1 %v557_v0 }
  0x37   :  { %396 = vmatprep.subr.mxu0 %v557_v0  ;;  %430 = vmatpush3.msra.mxu1 %v557_v0 }
  0x38   :  { %397 = vmatpush3.msra.mxu0 %v557_v0  ;;  %431 = vmatprep.subr.mxu1 %v557_v0 }
  0x39   :  { %398 = vmatprep.subr.mxu0 %v557_v0  ;;  %432 = vmatpush3.msra.mxu1 %v557_v0 }
  0x3a   :  { %399 = vmatpush3.msra.mxu0 %v557_v0  ;;  %433 = vmatprep.subr.mxu1 %v557_v0 }
  0x3b   :  { %400 = vmatprep.subr.mxu0 %v557_v0  ;;  %434 = vmatpush3.msra.mxu1 %v557_v0 }
  0x3c   :  { %401 = vmatpush3.msra.mxu0 %v557_v0  ;;  %435 = vmatprep.subr.mxu1 %v557_v0 }
  0x3d   :  { %403 = vmatmul.mubr.f32.vlgmr.msra.gmra.mxu0 %v45_v6  ;;  %440 = vmatprep.subr.mxu0 %v557_v0 }
  0x3e   :  { %441 = vmatpush3.msra.mxu0 %v557_v0  ;;  %436 = vmatpush3.msra.mxu1 %v557_v0 }
  0x3f   :  { %442 = vmatprep.subr.mxu0 %v557_v0  ;;  %437 = vmatprep.mubr.f32.mxu1 %v121_v7 }
  0x40   :  { %443 = vmatpush3.msra.mxu0 %v557_v0  ;;  %438 = vmatmul.mubr.f32.vlgmr.msra.gmra.mxu1 %v122_v8 }
  0x41   :  { %444 = vmatprep.subr.mxu0 %v557_v0  ;;  %472 = vmatprep.mubr.f32.mxu0 %v198_v9 }
  0x42   :  { %445 = vmatpush3.msra.mxu0 %v557_v0 }
  0x43   :  { %446 = vmatprep.subr.mxu0 %v557_v0 }
  0x44   :  { %447 = vmatpush3.msra.mxu0 %v557_v0 }
  0x45   :  { %448 = vmatprep.subr.mxu0 %v557_v0 }
  0x46   :  { %449 = vmatpush3.msra.mxu0 %v557_v0 }
  0x47   :  { %450 = vmatprep.subr.mxu0 %v557_v0 }
  0x48   :  { %451 = vmatpush3.msra.mxu0 %v557_v0 }
  0x49   :  { %452 = vmatprep.subr.mxu0 %v557_v0 }
  0x4a   :  { %453 = vmatpush3.msra.mxu0 %v557_v0 }
  0x4b   :  { %454 = vmatprep.subr.mxu0 %v557_v0 }
  0x4c   :  { %455 = vmatpush3.msra.mxu0 %v557_v0 }
  0x4d   :  { %456 = vmatprep.subr.mxu0 %v557_v0 }
  0x4e   :  { %457 = vmatpush3.msra.mxu0 %v557_v0 }
  0x4f   :  { %458 = vmatprep.subr.mxu0 %v557_v0 }
  0x50   :  { %459 = vmatpush3.msra.mxu0 %v557_v0 }
  0x51   :  { %460 = vmatprep.subr.mxu0 %v557_v0 }
  0x52   :  { %461 = vmatpush3.msra.mxu0 %v557_v0 }
  0x53   :  { %462 = vmatprep.subr.mxu0 %v557_v0 }
  0x54   :  { %463 = vmatpush3.msra.mxu0 %v557_v0 }
  0x55   :  { %464 = vmatprep.subr.mxu0 %v557_v0 }
  0x56   :  { %465 = vmatpush3.msra.mxu0 %v557_v0 }
  0x57   :  { %466 = vmatprep.subr.mxu0 %v557_v0 }
  0x58   :  { %467 = vmatpush3.msra.mxu0 %v557_v0 }
  0x59   :  { %468 = vmatprep.subr.mxu0 %v557_v0 }
  0x5a   :  { %469 = vmatpush3.msra.mxu0 %v557_v0 }
  0x5b   :  { %470 = vmatprep.subr.mxu0 %v557_v0 }
  0x5c   :  { %471 = vmatpush3.msra.mxu0 %v557_v0 }
  0x5d   :  { %473 = vmatmul.mubr.f32.vlgmr.msra.gmra.mxu0 %v199_v10 }
  0xfd   :  { %v404_v11 = vpop.f32.mrf.mxu0 }
  0xff   :  { %v112_v12 = vpop.f32.mrf.mxu0 }
 0x100   :  { %v439_v13 = vpop.f32.mrf.mxu1 }
 0x102   :  { %v189_v16 = vpop.f32.mrf.mxu1 }
 0x11d   :  { %v474_v14 = vpop.f32.mrf.mxu0 }
 0x11e   :  { %v276_v15 = vmul.f32 %v474_v14, %v439_v13 }
 0x11f   :  { %v266_v17 = vpop.f32.mrf.mxu0 }
 0x120   :  { %v278_v18 = vmax.f32 %v276_v15, 1e-16  ;;  %v275_v19 = vmul.f32 %v266_v17, %v189_v16 }
 0x122   :  { %483 = vrsqrt.f32 %v278_v18  ;;  %v277_v20 = vmax.f32 %v275_v19, 1e-16 }
 0x124   :  { %485 = vrsqrt.f32 %v277_v20 }
 0x12f   :  { %v484_v21 = vpop.eup %483 }
 0x130   :  { %v282_v22 = vmul.f32 %v484_v21, %v404_v11 }
 0x131   :  { %v486_v23 = vpop.eup %485 }
 0x132   :  { %v281_v24 = vmul.f32 %v486_v23, %v112_v12  ;;  %v284_v25 = vsub.f32 1.0, %v282_v22 }
 0x134   :  { %v283_v26 = vsub.f32 1.0, %v281_v24  ;;  %v287_v28 = vsel %vm285_vm0, %v284_v25, 0.0 }
 0x136   :  { %v286_v27 = vsel %vm285_vm0, %v283_v26, 0.0 }
 0x137   :  { %v288_v29 = vadd.f32 %v287_v28, %v286_v27 }
 0x139   :  { %289 = vadd.xlane.f32.xlu0 %v288_v29 }
 0x1c2   :  { %v290_v30 = vpop.xlane.xlu0 %289 }
 0x1c3   :  { %v291_v31 = vrot.slane %v290_v30, 4 }
 0x1c5   :  { %v292_v32 = vadd.f32 %v291_v31, %v290_v30 }
 0x1c7   :  { %v293_v33 = vrot.slane %v292_v32, 2 }
 0x1c9   :  { %v294_v34 = vadd.f32 %v293_v33, %v292_v32 }
 0x1cb   :  { %v295_v35 = vrot.slane %v294_v34, 1 }
 0x1cd   :  { %v296_v36 = vadd.f32 %v295_v35, %v294_v34 }
 0x1cf   :  { %475 = vpush %v296_v36 }
 0x200   :  { %s476_s21 = spop %475 }
 0x201   :  { %v298_v37 = vstv %s476_s21 }
 0x202   :  { %299 = vst [vmem:[#allocation7] sm:$0x1] %v298_v37 }
 0x203   :  { %538 = shalt.err (!%p535_p0)
}
 0x204   :  { %309 = dma.vmem_to_hbm [thread:$0]  %s307_s1, 16, %s681_s2, [#allocation4]  }
 0x205   :  { %551 = dma.done.wait [#allocation4], 16  }
 0x206   :  { %552 = vsyncadd [#allocation4], 4294967280 }
 0x207   :  { %313 = vsyncpa [#allocation3], 1 }
 0x208   :  { %314 = vsyncpa [#allocation6], 1 }
 0x209   :  { %315 = vsyncpa [#allocation4], 1 }

</bundles_post_ra>
